<compile_context>
chip_gen: v5e
topology: v5e:2x2
jax: 0.10.0
libtpu: 0.0.40
codegen_flags: <defaults>
</compile_context>

<pallas_src>
import functools

import jax
import jax.numpy as jnp
from jax.experimental import pallas as pl
from jax.experimental.pallas import tpu as pltpu


def _round_up(x, m):
    return (x + m - 1) // m * m


def _gru_kernel(Kp, Hp, xh_ref, w_ref, b_ref, out_ref):
    lhs = xh_ref[...]                                    # (TB, Kp+Hp)

    # One fused MXU matmul; result columns = [r_sum | i_sum | x_n | h_n].
    acc = jnp.dot(lhs, w_ref[...], preferred_element_type=jnp.float32)

    b = b_ref[...]                                       # (4, Hp) f32
    resetgate = jax.nn.sigmoid(acc[:, 0 * Hp:1 * Hp] + b[0:1])
    inputgate = jax.nn.sigmoid(acc[:, 1 * Hp:2 * Hp] + b[1:2])
    newgate = jnp.tanh(acc[:, 2 * Hp:3 * Hp] + b[2:3]
                       + resetgate * (acc[:, 3 * Hp:] + b[3:4]))

    # hidden tile is the lane-aligned tail of the fused LHS (Kp % 128 == 0).
    h = lhs[:, Kp:].astype(jnp.float32)
    hy = newgate + inputgate * (h - newgate)
    out_ref[...] = hy.astype(out_ref.dtype)


def prepare_graph_gru_params(Wx, bx, Wh, bh, *, matmul_dtype=jnp.bfloat16):
    """One-time layout plumbing (hoist out of the per-call / per-step path).

    Builds the combined (Kp+Hp, 4*Hp) weight with column blocks
    [r_sum | i_sum | x_n | h_n] (zero sub-blocks where a term does not apply)
    and the packed (4, Hp) bias rows [bx_r+bh_r, bx_i+bh_i, bx_n, bh_n].
    """
    K, threeH = Wx.shape
    H = threeH // 3
    assert threeH == 3 * H
    assert Wh.shape == (H, 3 * H)
    assert bx.shape == (3 * H,) and bh.shape == (3 * H,)

    Kp = _round_up(max(K, 128), 128)
    Hp = _round_up(max(H, 128), 128)
    f32 = jnp.float32

    Wx_r, Wx_i, Wx_n = (Wx[:, g * H:(g + 1) * H].astype(f32) for g in range(3))
    Wh_r, Wh_i, Wh_n = (Wh[:, g * H:(g + 1) * H].astype(f32) for g in range(3))

    def col_pad(a):
        return jnp.pad(a, ((0, 0), (0, Hp - H)))

    top = jnp.concatenate(                                   # x rows: (K, 4*Hp)
        [col_pad(Wx_r), col_pad(Wx_i), col_pad(Wx_n), jnp.zeros((K, Hp), f32)],
        axis=1)
    bot = jnp.concatenate(                                   # h rows: (H, 4*Hp)
        [col_pad(Wh_r), col_pad(Wh_i), jnp.zeros((H, Hp), f32), col_pad(Wh_n)],
        axis=1)
    W = jnp.concatenate(
        [jnp.pad(top, ((0, Kp - K), (0, 0))),
         jnp.pad(bot, ((0, Hp - H), (0, 0)))],
        axis=0).astype(matmul_dtype)                         # (Kp+Hp, 4*Hp)

    bx3 = bx.reshape(3, H).astype(f32)
    bh3 = bh.reshape(3, H).astype(f32)
    b = jnp.stack([bx3[0] + bh3[0],      # r (pre-folded)
                   bx3[1] + bh3[1],      # i (pre-folded)
                   bx3[2],               # n, x side
                   bh3[2]])              # n, h side (inside resetgate * (...))
    b = jnp.pad(b, ((0, 0), (0, Hp - H)))                    # (4, Hp)

    return {"W": W, "b": b, "K": K, "H": H, "Kp": Kp, "Hp": Hp}


def graph_gru_cell(x, hidden, params, *, batch_tile=256, vmem_limit_bytes=None):
    """Graph_GRUCell forward.

    x: [B, input_size], hidden: [B, hidden_size] -> hy: [B, hidden_size].
    (The B == 1 `.squeeze()` 1-D path of the PyTorch module is not reproduced;
    chunk(3, 1) on a 1-D tensor errors in PyTorch anyway.)
    """
    B, K = x.shape
    Bh, H = hidden.shape
    assert Bh == B and K == params["K"] and H == params["H"]
    Kp, Hp = params["Kp"], params["Hp"]
    W, b = params["W"], params["b"]
    mm_dtype = W.dtype
    out_dtype = hidden.dtype

    # Batch tile: sublane-aligned (8 for f32, 16 for 16-bit operands); prefer
    # >= 2 grid steps when the batch allows it so ("parallel",) can use both
    # v7x TensorCores (no-op on single-TC v5e/v6e).
    sublane = 16 if (jnp.dtype(mm_dtype).itemsize < 4
                     or jnp.dtype(out_dtype).itemsize < 4) else 8
    Bp_nat = _round_up(B, sublane)
    TB = min(_round_up(max(1, min(batch_tile, B)), sublane), Bp_nat)
    if Bp_nat // TB < 2 and Bp_nat >= 2 * sublane:
        TB = _round_up(pl.cdiv(Bp_nat, 2), sublane)
    Bp = _round_up(B, TB)
    grid = (Bp // TB,)

    # VMEM budget derived from the real live set (resident W/b single-buffered
    # + double-buffered xh/out tiles + f32 gate temporaries + headroom),
    # clamped well below v7x's 64 MiB physical VMEM for small problems.
    if vmem_limit_bytes is None:
        isz = lambda dt: jnp.dtype(dt).itemsize
        est = (W.size * isz(W.dtype) + b.size * isz(b.dtype)
               + 2 * TB * (Kp + Hp) * isz(mm_dtype)      # xh tiles (x2 buffers)
               + 2 * TB * Hp * isz(out_dtype)            # out tiles (x2 buffers)
               + 10 * TB * Hp * 4                        # acc + gate temporaries
               + (4 << 20))                              # headroom
        vmem_limit_bytes = int(min(max(est, 16 << 20), 100 << 20))

    # Fused, lane-dense LHS [x | h]: contraction dim Kp+Hp fills the MXU.
    xh = jnp.concatenate(
        [jnp.pad(x, ((0, Bp - B), (0, Kp - K))),
         jnp.pad(hidden, ((0, Bp - B), (0, Hp - H)))],
        axis=1).astype(mm_dtype)                         # (Bp, Kp+Hp)

    xh_spec = pl.BlockSpec((TB, Kp + Hp), lambda i: (i, 0))
    out_spec = pl.BlockSpec((TB, Hp), lambda i: (i, 0))
    # Whole-array VMEM residents: single-buffered, copied once, reused by
    # every batch tile.
    resident = pl.BlockSpec(memory_space=pltpu.MemorySpace.VMEM)

    out = pl.pallas_call(
        functools.partial(_gru_kernel, Kp, Hp),
        out_shape=jax.ShapeDtypeStruct((Bp, Hp), out_dtype),
        grid_spec=pltpu.PrefetchScalarGridSpec(
            num_scalar_prefetch=0,
            grid=grid,
            in_specs=[xh_spec, resident, resident],
            out_specs=out_spec,
        ),
        compiler_params=pltpu.CompilerParams(
            dimension_semantics=("parallel",),
            vmem_limit_bytes=vmem_limit_bytes,
        ),
    )(xh, W, b)

    return out[:B, :H]


def graph_gru_cell_ref(x, hidden, Wx, bx, Wh, bh):
    """Pure-JAX reference mirroring the PyTorch module."""
    gate_x = x @ Wx + bx
    gate_h = hidden @ Wh + bh
    H = hidden.shape[1]
    i_r, i_i, i_n = gate_x[:, :H], gate_x[:, H:2 * H], gate_x[:, 2 * H:]
    h_r, h_i, h_n = gate_h[:, :H], gate_h[:, H:2 * H], gate_h[:, 2 * H:]
    resetgate = jax.nn.sigmoid(i_r + h_r)
    inputgate = jax.nn.sigmoid(i_i + h_i)
    newgate = jnp.tanh(i_n + resetgate * h_n)
    return newgate + inputgate * (hidden - newgate)


if __name__ == "__main__":
    key = jax.random.PRNGKey(0)
    B, input_size, hidden_size = 16, 16, 32

    k = jax.random.split(key, 6)
    stdv = 1.0 / jnp.sqrt(hidden_size)

    # Deterministic synthetic parameters (shapes per Graph_Linear).
    Wx = jax.random.uniform(k[0], (input_size, 3 * hidden_size),
                            jnp.float32, -stdv, stdv)
    bx = jax.random.uniform(k[1], (3 * hidden_size,), jnp.float32, -stdv, stdv)
    Wh = jax.random.uniform(k[2], (hidden_size, 3 * hidden_size),
                            jnp.float32, -stdv, stdv)
    bh = jax.random.uniform(k[3], (3 * hidden_size,), jnp.float32, -stdv, stdv)

    x = jax.random.normal(k[4], (B, input_size), jnp.float32)
    hidden = jax.random.normal(k[5], (B, hidden_size), jnp.float32)

    hy_ref = graph_gru_cell_ref(x, hidden, Wx, bx, Wh, bh)

    # f32-matmul path: exact check against the reference. Small batch_tile so
    # the batch grid / pipelined LHS tiles are actually exercised (grid=(2,)).
    params_f32 = prepare_graph_gru_params(Wx, bx, Wh, bh,
                                          matmul_dtype=jnp.float32)
    hy_f32 = jax.block_until_ready(
        graph_gru_cell(x, hidden, params_f32, batch_tile=8))
    assert hy_f32.shape == (B, hidden_size)
    assert hy_f32.dtype == hidden.dtype
    assert jnp.allclose(hy_f32, hy_ref, atol=1e-5, rtol=1e-5)

    # Default bf16-matmul fast path (MXU-friendly on v5e/v6e/v7x); gate math
    # stays f32, so only matmul/rounding noise vs the reference.
    params_bf16 = prepare_graph_gru_params(Wx, bx, Wh, bh)
    hy_bf16 = jax.block_until_ready(
        graph_gru_cell(x, hidden, params_bf16, batch_tile=8))
    assert hy_bf16.shape == (B, hidden_size)
    assert jnp.allclose(hy_bf16, hy_ref, atol=3e-2, rtol=3e-2)

    print("KERNEL_OK")
</pallas_src>

<mosaic_0001>
module attributes {stable_mosaic.version = 11 : i64} {
  func.func @_gru_kernel(%arg0: i32, %arg1: memref<8x256xf32, #tpu.memory_space<vmem>>, %arg2: memref<256x512xf32, #tpu.memory_space<vmem>>, %arg3: memref<4x128xf32, #tpu.memory_space<vmem>>, %arg4: memref<8x128xf32, #tpu.memory_space<vmem>>) attributes {dimension_semantics = [#tpu.dimension_semantics<parallel>], iteration_bounds = array<i64: 2>, scalar_prefetch = 0 : i64, scratch_operands = 0 : i64, tpu.core_type = #tpu.core_type<tc>, window_params = [{transform_indices = @transform_0, window_bounds = array<i64: 8, 256>}, {pipeline_mode = #tpu.pipeline_mode<synchronous>, transform_indices = @transform_1, window_bounds = array<i64: 256, 512>}, {pipeline_mode = #tpu.pipeline_mode<synchronous>, transform_indices = @transform_2, window_bounds = array<i64: 4, 128>}, {transform_indices = @transform_3, window_bounds = array<i64: 8, 128>}]} {
    %c0 = arith.constant 0 : index
    %c0_0 = arith.constant 0 : index
    %0 = vector.load %arg1[%c0, %c0_0] : memref<8x256xf32, #tpu.memory_space<vmem>>, vector<8x256xf32>
    %c0_1 = arith.constant 0 : index
    %c0_2 = arith.constant 0 : index
    %1 = vector.load %arg2[%c0_1, %c0_2] : memref<256x512xf32, #tpu.memory_space<vmem>>, vector<256x512xf32>
    %cst = arith.constant dense<0.000000e+00> : vector<8x512xf32>
    %2 = tpu.matmul %0, %1, %cst {dimension_numbers = #tpu.dot_dimension_numbers<[1], [0], [0], [1], [0, 0, 1, 1], [], []>} : vector<8x256xf32>, vector<256x512xf32>, vector<8x512xf32> -> vector<8x512xf32>
    %c0_3 = arith.constant 0 : index
    %c0_4 = arith.constant 0 : index
    %3 = vector.load %arg3[%c0_3, %c0_4] : memref<4x128xf32, #tpu.memory_space<vmem>>, vector<4x128xf32>
    %4 = vector.extract_strided_slice %2 {offsets = [0, 0], sizes = [8, 128], strides = [1, 1]} : vector<8x512xf32> to vector<8x128xf32>
    %5 = vector.extract_strided_slice %3 {offsets = [0, 0], sizes = [1, 128], strides = [1, 1]} : vector<4x128xf32> to vector<1x128xf32>
    %6 = vector.broadcast %5 : vector<1x128xf32> to vector<8x128xf32>
    %7 = arith.addf %4, %6 : vector<8x128xf32>
    %8 = arith.negf %7 : vector<8x128xf32>
    %9 = math.exp %8 : vector<8x128xf32>
    %cst_5 = arith.constant 1.000000e+00 : f32
    %10 = vector.broadcast %cst_5 : f32 to vector<8x128xf32>
    %11 = arith.addf %10, %9 : vector<8x128xf32>
    %12 = arith.divf %10, %11 : vector<8x128xf32>
    %13 = vector.extract_strided_slice %2 {offsets = [0, 128], sizes = [8, 128], strides = [1, 1]} : vector<8x512xf32> to vector<8x128xf32>
    %14 = vector.extract_strided_slice %3 {offsets = [1, 0], sizes = [1, 128], strides = [1, 1]} : vector<4x128xf32> to vector<1x128xf32>
    %15 = vector.broadcast %14 : vector<1x128xf32> to vector<8x128xf32>
    %16 = arith.addf %13, %15 : vector<8x128xf32>
    %17 = arith.negf %16 : vector<8x128xf32>
    %18 = math.exp %17 : vector<8x128xf32>
    %cst_6 = arith.constant 1.000000e+00 : f32
    %19 = vector.broadcast %cst_6 : f32 to vector<8x128xf32>
    %20 = arith.addf %19, %18 : vector<8x128xf32>
    %21 = arith.divf %19, %20 : vector<8x128xf32>
    %22 = vector.extract_strided_slice %2 {offsets = [0, 256], sizes = [8, 128], strides = [1, 1]} : vector<8x512xf32> to vector<8x128xf32>
    %23 = vector.extract_strided_slice %3 {offsets = [2, 0], sizes = [1, 128], strides = [1, 1]} : vector<4x128xf32> to vector<1x128xf32>
    %24 = vector.broadcast %23 : vector<1x128xf32> to vector<8x128xf32>
    %25 = arith.addf %22, %24 : vector<8x128xf32>
    %26 = vector.extract_strided_slice %2 {offsets = [0, 384], sizes = [8, 128], strides = [1, 1]} : vector<8x512xf32> to vector<8x128xf32>
    %27 = vector.extract_strided_slice %3 {offsets = [3, 0], sizes = [1, 128], strides = [1, 1]} : vector<4x128xf32> to vector<1x128xf32>
    %28 = vector.broadcast %27 : vector<1x128xf32> to vector<8x128xf32>
    %29 = arith.addf %26, %28 : vector<8x128xf32>
    %30 = arith.mulf %12, %29 : vector<8x128xf32>
    %31 = arith.addf %25, %30 : vector<8x128xf32>
    %32 = math.tanh %31 : vector<8x128xf32>
    %33 = vector.extract_strided_slice %0 {offsets = [0, 128], sizes = [8, 128], strides = [1, 1]} : vector<8x256xf32> to vector<8x128xf32>
    %34 = arith.subf %33, %32 : vector<8x128xf32>
    %35 = arith.mulf %21, %34 : vector<8x128xf32>
    %36 = arith.addf %32, %35 : vector<8x128xf32>
    %c0_7 = arith.constant 0 : index
    %c0_8 = arith.constant 0 : index
    %37 = vector.load %arg4[%c0_7, %c0_8] : memref<8x128xf32, #tpu.memory_space<vmem>>, vector<8x128xf32>
    tpu.vector_store %arg4[%c0_7, %c0_8], %36 {strides = array<i32>} : memref<8x128xf32, #tpu.memory_space<vmem>>, vector<8x128xf32>,
    return
  }
  func.func @transform_0(%arg0: i32) -> (i32, i32) {
    %c0_i32 = arith.constant 0 : i32
    %c0_i32_0 = arith.constant 0 : i32
    return %arg0, %c0_i32 : i32, i32
  }
  func.func @transform_1(%arg0: i32) -> (i32, i32) {
    %c0_i32 = arith.constant 0 : i32
    %c0_i32_0 = arith.constant 0 : i32
    %c0_i32_1 = arith.constant 0 : i32
    return %c0_i32, %c0_i32_0 : i32, i32
  }
  func.func @transform_2(%arg0: i32) -> (i32, i32) {
    %c0_i32 = arith.constant 0 : i32
    %c0_i32_0 = arith.constant 0 : i32
    %c0_i32_1 = arith.constant 0 : i32
    return %c0_i32, %c0_i32_0 : i32, i32
  }
  func.func @transform_3(%arg0: i32) -> (i32, i32) {
    %c0_i32 = arith.constant 0 : i32
    %c0_i32_0 = arith.constant 0 : i32
    return %arg0, %c0_i32 : i32, i32
  }
}

</mosaic_0001>

<bundles_post_ra>
// kernel: tpu_custom_call.1
= control target key start
LH: loop header
LB: loop body
LE: loop exit
PB: predicated region body
PF: predicated region fallthrough
CT: control target
= control target key end

     0   :  { %8 = vsyncpa [#allocation3], 0  ;;  %s1117_s0 = inlined_call_operand.hbm [shape: f32[16,256], index: 0, kind: input, shape index: {}]   ;;  %s1118_s1 = inlined_call_operand.hbm [shape: f32[256,512], index: 1, kind: input, shape index: {}]   ;;  %s1119_s2 = inlined_call_operand.hbm [shape: f32[4,128], index: 2, kind: input, shape index: {}]   ;;  %s1120_s3 = inlined_call_operand.hbm [shape: f32[16,128], index: 3, kind: output, shape index: {}]  }
   0x1   :  { %10 = vsyncpa [#allocation3 + $0x1], 0 }
   0x2   :  { %11 = vsyncpa [#allocation6], 0 }
   0x3   :  { %12 = vsyncpa [#allocation4], 0 }
   0x4   :  { %14 = vsyncpa [#allocation4 + $0x1], 0  ;;  %s954_s12 = smov 0   ;;  %s956_s13 = smov 0  }
   0x5   :  { %s958_s14 = smov 0   ;;  %s960_s15 = smov 0  }
   0x6 LB: > { %s130_s18 = sshll.u32 %s1118_s1, 4  ;;  %s978_s19 = sadd.s32 4294967295, %s928_s15   ;;  %s928_s15 = sphi %s960_s15, %s1131_s15   ;;  %s924_s14 = sphi %s958_s14, %s1130_s14   ;;  %s920_s13 = sphi %s956_s13, %s1129_s13   ;;  %s916_s12 = sphi %s954_s12, %s1128_s12   ;;  %s131_s18 = int_to_ptr.hbm [resolvable:$true] %s130_s18 }
   0x7   : > { %p670_p0 = scmp.ge.s32.totalorder %s928_s15, 1  ;;  %p41_p1 = scmp.eq.s32.totalorder %s978_s19, 0 }
   0x8   : > { %p119_p2 = scmp.lt.s32.totalorder %s928_s15, 3  ;;  %s930_s21 = smov [#allocation5]  }
   0x9   : > { %s132_s22 = sshll.u32 %s930_s21, 4  ;;  %s145_s25 = sshll.u32 %s1119_s2, 4  ;;  %s133_s22 = int_to_ptr.vmem [resolvable:$true] %s132_s22  ;;  %s146_s25 = int_to_ptr.hbm [resolvable:$true] %s145_s25 }
   0xa   : > { %p983_p3 = pnand %p670_p0, %p119_p2  ;;  %s931_s26 = smov [#allocation7]  }
   0xb   : > { %s147_s27 = sshll.u32 %s931_s26, 4  ;;  %s932_s28 = smov 512   ;;  %s148_s27 = int_to_ptr.vmem [resolvable:$true] %s147_s27 }
   0xc   : > { %p701_p4 = pneg %p983_p3  ;;  %s933_s29 = smov 32  }
   0xd   : > { %s669_s30 = sadd.s32 4294967294, %s928_s15   ;;  %s997_s4 = sadd.s32 1, %s928_s15  }
   0xe   : > { %p702_p6 = pnand %p701_p4, %p41_p1  ;;  %s24_s5 = ssub.s32 %s928_s15, %s997_s4 }
   0xf   : > { %s27_s6 = sadd.s32 1, %s924_s14  ;;  %p25_p7 = scmp.eq.s32.totalorder %s24_s5, 0 }
  0x10   : > { %704 = dma.hbm_to_vmem [thread:$0]  (!%p702_p6), %s131_s18, 16384, %s133_s22, [#allocation6], %s932_s28, %s932_s28, %s933_s29  }
  0x11   : > { %707 = dma.hbm_to_vmem [thread:$0]  (!%p702_p6), %s146_s25, 64, %s148_s27, [#allocation6]  }
  0x12   : > { %p34_p8 = scmp.ne.s32.totalorder %s924_s14, %s920_s13  ;;  %p35_p9 = scmp.eq.s32.totalorder %s928_s15, 0 }
  0x13   : > { %p40_p10 = scmp.ne.s32.totalorder %s920_s13, %s916_s12  ;;  %p106_p13 = scmp.eq.s32.totalorder %s978_s19, 1 }
  0x14   : > { %s1008_s7 = scalar_select %p25_p7, %s924_s14, %s27_s6  }
  0x15   : > { %p1010_p11 = por %p35_p9, %p34_p8  ;;  %p1016_p12 = por %p41_p1, %p40_p10 }
  0x16   : > { %p112_p0 = scmp.eq.s32.totalorder %s669_s30, 1  ;;  %p718_p2 = scmp.lt.s32.totalorder %s928_s15, 2 }
  0x17   : > { %s158_s10 = sand.u32 1, %s924_s14   ;;  %p1023_p4 = por %p106_p13, %p34_p8 }
  0x18   : > { %p1027_p6 = por %p112_p0, %p40_p10  ;;  %s674_s17 = sshll.u32 %s158_s10, 4 }
  0x19   : > { %s688_s18 = sshll.u32 %s928_s15, 4  ;;  %s162_s24 = scalar_lea.vmem [#allocation2], %s674_s17 }
  0x1a   : > { %s167_s23 = scalar_lea.hbm %s1117_s0, %s688_s18  ;;  %s171_s25 = sshll.u32 %s162_s24, 4  ;;  %s172_s25 = int_to_ptr.vmem [resolvable:$true] %s171_s25 }
  0x1b   : > { %s169_s26 = sshll.u32 %s167_s23, 4  ;;  %p1037_p7 = pnand %p718_p2, %p1010_p11  ;;  %s170_s26 = int_to_ptr.hbm [resolvable:$true] %s169_s26 }
  0x1c   : > { %s159_s28 = scalar_lea.sflag [#allocation3], %s158_s10  ;;  %s828_s29 = sshra.s32 %s170_s26, 4  ;;  %s829_s29 = int_to_ptr.hbm [resolvable:$true] %s828_s29 }
  0x1d   : > { %s830_s30 = scalar_lea.hbm %s829_s29, 16  ;;  %p832_p9 = pneg %p1037_p7 }
  0x1e   : > { %p831_p8 = scmp.ne.s32.totalorder %s829_s29, %s830_s30  ;;  %s835_s17 = scalar_lea.hbm %s1117_s0, 32 }
  0x1f   : > { %p836_p11 = scmp.lt.s32.totalorder %s829_s29, %s1117_s0  ;;  %p837_p0 = scmp.lt.s32.totalorder %s835_s17, %s830_s30 }
  0x20   : > { %p833_p10 = pnand %p832_p9, %p831_p8 }
  0x21   : > { %p838_p2 = por %p837_p0, %p836_p11 }
  0x22   : > { %p834_p13 = pneg %p833_p10 }
  0x24   : > { %p839_p5 = pnand %p838_p2, %p834_p13 }
  0x26   : > { %842 = shalt.err (!%p839_p5)
}
  0x27   : > { %711 = dma.hbm_to_vmem [thread:$0]  (!%p1037_p7), %s170_s26, 256, %s172_s25, %s159_s28  }
  0x28   : > { %180 = sbr.rel (%p983_p3) target bundleno = 269 (0x10d), region = 32  ;;  %s1054_s10 = sand.u32 (!%p983_p3), 1, %s920_s13  }
  0x29   : > { %s678_s21 = sshll.u32 (!%p983_p3), %s1054_s10, 4  ;;  %s183_s22 = scalar_lea.sflag (!%p983_p3), [#allocation3], %s1054_s10 }
  0x2a   : > { %s1058_s23 = scalar_lea.vmem (!%p983_p3), [#allocation2], %s678_s21 }
  0x2d   : > { %903 = dma.done.wait (%p1016_p12), %s183_s22, 256  }
  0x2e   : > { %905 = vsyncadd (%p1016_p12), %s183_s22, 4294967040 }
  0x2f   : > { %907 = dma.done.wait (%p41_p1), [#allocation6], 16448  }
  0x30   : > { %909 = vsyncadd (%p41_p1), [#allocation6], 4294950848  ;;  %v282_v0 = vld [vmem:[#allocation5 + $0x1e0] sm:$0xff]  ;;  %v283_v2 = vld [vmem:[#allocation5 + $0x1e8] sm:$0xff]  ;;  %s681_s20 = sshll.u32 %s1054_s10, 3  ;;  %s685_s9 = sshll.u32 %s978_s19, 3 }
  0x31   : > { %v346_v1 = vld [vmem:[#allocation5 + $0x3e0] sm:$0xff]  ;;  %350 = vmatpush.msra.mxu0 %v282_v0  ;;  %v347_v3 = vld [vmem:[#allocation5 + $0x3e8] sm:$0xff]  ;;  %390 = vmatpush.msra.mxu2 %v283_v2  ;;  %v285_v2 = vld [vmem:[#allocation5 + $0x1f8] sm:$0xff]  ;;  %s575_s26 = scalar_lea.hbm %s1120_s3, %s685_s9  ;;  %s219_s27 = scalar_lea.vmem [#allocation8], %s681_s20 }
  0x32   : > { %370 = vmatpush.msra.mxu1 %v346_v1  ;;  %v278_v4 = vld [vmem:[#allocation5 + $0x1c0] sm:$0xff]  ;;  %410 = vmatpush.msra.mxu3 %v347_v3  ;;  %v279_v6 = vld [vmem:[#allocation5 + $0x1c8] sm:$0xff]  ;;  %v349_v3 = vld [vmem:[#allocation5 + $0x3f8] sm:$0xff]  ;;  %s577_s28 = sshll.u32 %s219_s27, 4  ;;  %s579_s29 = sshll.u32 %s575_s26, 4  ;;  %s578_s28 = int_to_ptr.vmem [resolvable:$true] %s577_s28  ;;  %s580_s29 = int_to_ptr.hbm [resolvable:$true] %s579_s29 }
  0x33   : > { %v342_v5 = vld [vmem:[#allocation5 + $0x3c0] sm:$0xff]  ;;  %v343_v7 = vld [vmem:[#allocation5 + $0x3c8] sm:$0xff]  ;;  %351 = vmatpush.msra.mxu0 %v278_v4  ;;  %391 = vmatpush.msra.mxu2 %v279_v6  ;;  %v281_v4 = vld [vmem:[#allocation5 + $0x1d8] sm:$0xff]  ;;  %s565_s19 = scalar_lea.sflag [#allocation4], %s1054_s10  ;;  %s872_s30 = sshra.s32 %s580_s29, 4  ;;  %s873_s30 = int_to_ptr.hbm [resolvable:$true] %s872_s30 }
  0x34   : > { %v274_v8 = vld [vmem:[#allocation5 + $0x1a0] sm:$0xff]  ;;  %371 = vmatpush.msra.mxu1 %v342_v5  ;;  %v275_v10 = vld [vmem:[#allocation5 + $0x1a8] sm:$0xff]  ;;  %411 = vmatpush.msra.mxu3 %v343_v7  ;;  %v345_v5 = vld [vmem:[#allocation5 + $0x3d8] sm:$0xff]  ;;  %s874_s5 = scalar_lea.hbm %s873_s30, 8  ;;  %s878_s18 = scalar_lea.hbm %s1120_s3, 16 }
  0x35   : > { %v338_v9 = vld [vmem:[#allocation5 + $0x3a0] sm:$0xff]  ;;  %v339_v11 = vld [vmem:[#allocation5 + $0x3a8] sm:$0xff]  ;;  %352 = vmatpush.msra.mxu0 %v274_v8  ;;  %392 = vmatpush.msra.mxu2 %v275_v10  ;;  %v284_v6 = vld [vmem:[#allocation5 + $0x1f0] sm:$0xff]  ;;  %p875_p1 = scmp.ne.s32.totalorder %s873_s30, %s874_s5  ;;  %p879_p12 = scmp.lt.s32.totalorder %s873_s30, %s1120_s3 }
  0x36   : > { %v270_v12 = vld [vmem:[#allocation5 + $0x180] sm:$0xff]  ;;  %372 = vmatpush.msra.mxu1 %v338_v9  ;;  %v271_v14 = vld [vmem:[#allocation5 + $0x188] sm:$0xff]  ;;  %412 = vmatpush.msra.mxu3 %v339_v11  ;;  %v348_v7 = vld [vmem:[#allocation5 + $0x3f0] sm:$0xff]  ;;  %p880_p7 = scmp.lt.s32.totalorder %s878_s18, %s874_s5 }
  0x37   : > { %v334_v13 = vld [vmem:[#allocation5 + $0x380] sm:$0xff]  ;;  %v335_v15 = vld [vmem:[#allocation5 + $0x388] sm:$0xff]  ;;  %353 = vmatpush.msra.mxu0 %v270_v12  ;;  %393 = vmatpush.msra.mxu2 %v271_v14  ;;  %v277_v8 = vld [vmem:[#allocation5 + $0x1b8] sm:$0xff]  ;;  %p876_p3 = pnand %p875_p1, %p1023_p4 }
  0x38   : > { %v266_v16 = vld [vmem:[#allocation5 + $0x160] sm:$0xff]  ;;  %373 = vmatpush.msra.mxu1 %v334_v13  ;;  %v267_v18 = vld [vmem:[#allocation5 + $0x168] sm:$0xff]  ;;  %413 = vmatpush.msra.mxu3 %v335_v15  ;;  %v341_v9 = vld [vmem:[#allocation5 + $0x3b8] sm:$0xff]  ;;  %p881_p8 = por %p880_p7, %p879_p12 }
  0x39   : > { %v330_v17 = vld [vmem:[#allocation5 + $0x360] sm:$0xff]  ;;  %v331_v19 = vld [vmem:[#allocation5 + $0x368] sm:$0xff]  ;;  %354 = vmatpush.msra.mxu0 %v266_v16  ;;  %394 = vmatpush.msra.mxu2 %v267_v18  ;;  %v280_v10 = vld [vmem:[#allocation5 + $0x1d0] sm:$0xff]  ;;  %p877_p5 = pneg %p876_p3 }
  0x3a   : > { %v262_v20 = vld [vmem:[#allocation5 + $0x140] sm:$0xff]  ;;  %374 = vmatpush.msra.mxu1 %v330_v17  ;;  %v263_v22 = vld [vmem:[#allocation5 + $0x148] sm:$0xff]  ;;  %414 = vmatpush.msra.mxu3 %v331_v19  ;;  %v344_v11 = vld [vmem:[#allocation5 + $0x3d0] sm:$0xff] }
  0x3b   : > { %v326_v21 = vld [vmem:[#allocation5 + $0x340] sm:$0xff]  ;;  %v327_v23 = vld [vmem:[#allocation5 + $0x348] sm:$0xff]  ;;  %355 = vmatpush.msra.mxu0 %v262_v20  ;;  %395 = vmatpush.msra.mxu2 %v263_v22  ;;  %v273_v12 = vld [vmem:[#allocation5 + $0x198] sm:$0xff]  ;;  %p882_p9 = pnand %p881_p8, %p877_p5 }
  0x3c   : > { %v258_v24 = vld [vmem:[#allocation5 + $0x120] sm:$0xff]  ;;  %375 = vmatpush.msra.mxu1 %v326_v21  ;;  %v259_v26 = vld [vmem:[#allocation5 + $0x128] sm:$0xff]  ;;  %415 = vmatpush.msra.mxu3 %v327_v23  ;;  %v337_v13 = vld [vmem:[#allocation5 + $0x398] sm:$0xff] }
  0x3d   : > { %v322_v25 = vld [vmem:[#allocation5 + $0x320] sm:$0xff]  ;;  %v323_v27 = vld [vmem:[#allocation5 + $0x328] sm:$0xff]  ;;  %356 = vmatpush.msra.mxu0 %v258_v24  ;;  %396 = vmatpush.msra.mxu2 %v259_v26  ;;  %v276_v14 = vld [vmem:[#allocation5 + $0x1b0] sm:$0xff] }
  0x3e   : > { %v254_v28 = vld [vmem:[#allocation5 + $0x100] sm:$0xff]  ;;  %376 = vmatpush.msra.mxu1 %v322_v25  ;;  %v255_v30 = vld [vmem:[#allocation5 + $0x108] sm:$0xff]  ;;  %416 = vmatpush.msra.mxu3 %v323_v27  ;;  %v340_v15 = vld [vmem:[#allocation5 + $0x3b0] sm:$0xff] }
  0x3f   : > { %v318_v29 = vld [vmem:[#allocation5 + $0x300] sm:$0xff]  ;;  %v319_v31 = vld [vmem:[#allocation5 + $0x308] sm:$0xff]  ;;  %357 = vmatpush.msra.mxu0 %v254_v28  ;;  %397 = vmatpush.msra.mxu2 %v255_v30  ;;  %v269_v16 = vld [vmem:[#allocation5 + $0x178] sm:$0xff] }
  0x40   : > { %v250_v32 = vld [vmem:[#allocation5 + $0xe0] sm:$0xff]  ;;  %377 = vmatpush.msra.mxu1 %v318_v29  ;;  %v251_v34 = vld [vmem:[#allocation5 + $0xe8] sm:$0xff]  ;;  %417 = vmatpush.msra.mxu3 %v319_v31  ;;  %v333_v17 = vld [vmem:[#allocation5 + $0x378] sm:$0xff] }
  0x41   : > { %v314_v33 = vld [vmem:[#allocation5 + $0x2e0] sm:$0xff]  ;;  %v315_v35 = vld [vmem:[#allocation5 + $0x2e8] sm:$0xff]  ;;  %358 = vmatpush.msra.mxu0 %v250_v32  ;;  %398 = vmatpush.msra.mxu2 %v251_v34  ;;  %v272_v18 = vld [vmem:[#allocation5 + $0x190] sm:$0xff] }
  0x42   : > { %v246_v36 = vld [vmem:[#allocation5 + $0xc0] sm:$0xff]  ;;  %378 = vmatpush.msra.mxu1 %v314_v33  ;;  %v247_v38 = vld [vmem:[#allocation5 + $0xc8] sm:$0xff]  ;;  %418 = vmatpush.msra.mxu3 %v315_v35  ;;  %v336_v19 = vld [vmem:[#allocation5 + $0x390] sm:$0xff] }
  0x43   : > { %v310_v37 = vld [vmem:[#allocation5 + $0x2c0] sm:$0xff]  ;;  %v311_v39 = vld [vmem:[#allocation5 + $0x2c8] sm:$0xff]  ;;  %359 = vmatpush.msra.mxu0 %v246_v36  ;;  %399 = vmatpush.msra.mxu2 %v247_v38  ;;  %v265_v20 = vld [vmem:[#allocation5 + $0x158] sm:$0xff] }
  0x44   : > { %v242_v40 = vld [vmem:[#allocation5 + $0xa0] sm:$0xff]  ;;  %379 = vmatpush.msra.mxu1 %v310_v37  ;;  %v243_v42 = vld [vmem:[#allocation5 + $0xa8] sm:$0xff]  ;;  %419 = vmatpush.msra.mxu3 %v311_v39  ;;  %v329_v21 = vld [vmem:[#allocation5 + $0x358] sm:$0xff] }
  0x45   : > { %v306_v41 = vld [vmem:[#allocation5 + $0x2a0] sm:$0xff]  ;;  %v307_v43 = vld [vmem:[#allocation5 + $0x2a8] sm:$0xff]  ;;  %360 = vmatpush.msra.mxu0 %v242_v40  ;;  %400 = vmatpush.msra.mxu2 %v243_v42  ;;  %v268_v22 = vld [vmem:[#allocation5 + $0x170] sm:$0xff] }
  0x46   : > { %v238_v44 = vld [vmem:[#allocation5 + $0x80] sm:$0xff]  ;;  %380 = vmatpush.msra.mxu1 %v306_v41  ;;  %v239_v46 = vld [vmem:[#allocation5 + $0x88] sm:$0xff]  ;;  %420 = vmatpush.msra.mxu3 %v307_v43  ;;  %v332_v23 = vld [vmem:[#allocation5 + $0x370] sm:$0xff] }
  0x47   : > { %v302_v45 = vld [vmem:[#allocation5 + $0x280] sm:$0xff]  ;;  %v303_v47 = vld [vmem:[#allocation5 + $0x288] sm:$0xff]  ;;  %361 = vmatpush.msra.mxu0 %v238_v44  ;;  %401 = vmatpush.msra.mxu2 %v239_v46  ;;  %v261_v24 = vld [vmem:[#allocation5 + $0x138] sm:$0xff] }
  0x48   : > { %v234_v48 = vld [vmem:[#allocation5 + $0x60] sm:$0xff]  ;;  %381 = vmatpush.msra.mxu1 %v302_v45  ;;  %v235_v50 = vld [vmem:[#allocation5 + $0x68] sm:$0xff]  ;;  %421 = vmatpush.msra.mxu3 %v303_v47  ;;  %v325_v25 = vld [vmem:[#allocation5 + $0x338] sm:$0xff] }
  0x49   : > { %v298_v49 = vld [vmem:[#allocation5 + $0x260] sm:$0xff]  ;;  %v299_v51 = vld [vmem:[#allocation5 + $0x268] sm:$0xff]  ;;  %362 = vmatpush.msra.mxu0 %v234_v48  ;;  %402 = vmatpush.msra.mxu2 %v235_v50  ;;  %v264_v26 = vld [vmem:[#allocation5 + $0x150] sm:$0xff] }
  0x4a   : > { %v230_v52 = vld [vmem:[#allocation5 + $0x40] sm:$0xff]  ;;  %382 = vmatpush.msra.mxu1 %v298_v49  ;;  %v231_v54 = vld [vmem:[#allocation5 + $0x48] sm:$0xff]  ;;  %422 = vmatpush.msra.mxu3 %v299_v51  ;;  %v328_v27 = vld [vmem:[#allocation5 + $0x350] sm:$0xff] }
  0x4b   : > { %v294_v53 = vld [vmem:[#allocation5 + $0x240] sm:$0xff]  ;;  %v295_v55 = vld [vmem:[#allocation5 + $0x248] sm:$0xff]  ;;  %363 = vmatpush.msra.mxu0 %v230_v52  ;;  %403 = vmatpush.msra.mxu2 %v231_v54  ;;  %v257_v28 = vld [vmem:[#allocation5 + $0x118] sm:$0xff] }
  0x4c   : > { %v226_v56 = vld [vmem:[#allocation5 + $0x20] sm:$0xff]  ;;  %383 = vmatpush.msra.mxu1 %v294_v53  ;;  %v227_v58 = vld [vmem:[#allocation5 + $0x28] sm:$0xff]  ;;  %423 = vmatpush.msra.mxu3 %v295_v55  ;;  %v321_v29 = vld [vmem:[#allocation5 + $0x318] sm:$0xff] }
  0x4d   : > { %v290_v57 = vld [vmem:[#allocation5 + $0x220] sm:$0xff]  ;;  %v291_v59 = vld [vmem:[#allocation5 + $0x228] sm:$0xff]  ;;  %364 = vmatpush.msra.mxu0 %v226_v56  ;;  %404 = vmatpush.msra.mxu2 %v227_v58  ;;  %v260_v30 = vld [vmem:[#allocation5 + $0x130] sm:$0xff] }
  0x4e   : > { %v222_v60 = vld [vmem:[#allocation5] sm:$0xff]  ;;  %384 = vmatpush.msra.mxu1 %v290_v57  ;;  %v223_v62 = vld [vmem:[#allocation5 + $0x8] sm:$0xff]  ;;  %424 = vmatpush.msra.mxu3 %v291_v59  ;;  %v324_v31 = vld [vmem:[#allocation5 + $0x330] sm:$0xff] }
  0x4f   : > { %v286_v61 = vld [vmem:[#allocation5 + $0x200] sm:$0xff]  ;;  %v287_v63 = vld [vmem:[#allocation5 + $0x208] sm:$0xff]  ;;  %365 = vmatpush.msra.mxu0 %v222_v60  ;;  %405 = vmatpush.msra.mxu2 %v223_v62  ;;  %v253_v32 = vld [vmem:[#allocation5 + $0xf8] sm:$0xff] }
  0x50   : > { %v1069_v0 = vld [vmem:[%s1058_s23] sm:$0xff]  ;;  %v1072_v1 = vld [vmem:[%s1058_s23 + $0x8] sm:$0xff]  ;;  %385 = vmatpush.msra.mxu1 %v286_v61  ;;  %425 = vmatpush.msra.mxu3 %v287_v63 }
  0x51   : > { %366 = vmatmul.f32.vlgmr.msra.gmra.mxu0 %v1069_v0  ;;  %386 = vmatmul.f32.vlgmr.msra.gmra.mxu1 %v1072_v1  ;;  %v317_v33 = vld [vmem:[#allocation5 + $0x2f8] sm:$0xff]  ;;  %v256_v34 = vld [vmem:[#allocation5 + $0x110] sm:$0xff] }
  0x52   : > { %470 = vmatpush.msrb.mxu2 %v285_v2  ;;  %490 = vmatpush.msrb.mxu3 %v349_v3  ;;  %v320_v35 = vld [vmem:[#allocation5 + $0x310] sm:$0xff]  ;;  %v249_v36 = vld [vmem:[#allocation5 + $0xd8] sm:$0xff] }
  0x53   : > { %406 = vmatmul.f32.vlgmr.msra.gmra.mxu2 %v1069_v0  ;;  %426 = vmatmul.f32.vlgmr.msra.gmra.mxu3 %v1072_v1  ;;  %v313_v37 = vld [vmem:[#allocation5 + $0x2d8] sm:$0xff]  ;;  %v252_v38 = vld [vmem:[#allocation5 + $0xf0] sm:$0xff] }
  0x54   : > { %471 = vmatpush.msrb.mxu2 %v281_v4  ;;  %491 = vmatpush.msrb.mxu3 %v345_v5  ;;  %v316_v39 = vld [vmem:[#allocation5 + $0x2f0] sm:$0xff]  ;;  %v245_v40 = vld [vmem:[#allocation5 + $0xb8] sm:$0xff]  ;;  %v510_v4 = vld [vmem:[#allocation7] sm:$0xf] }
  0x55   : > { %430 = vmatpush.msrb.mxu0 %v284_v6  ;;  %450 = vmatpush.msrb.mxu1 %v348_v7  ;;  %v309_v41 = vld [vmem:[#allocation5 + $0x2b8] sm:$0xff]  ;;  %v248_v42 = vld [vmem:[#allocation5 + $0xd0] sm:$0xff]  ;;  %v511_v5 = vperm.slane %v510_v4, 0 }
  0x56   : > { %472 = vmatpush.msrb.mxu2 %v277_v8  ;;  %492 = vmatpush.msrb.mxu3 %v341_v9  ;;  %v312_v43 = vld [vmem:[#allocation5 + $0x2d0] sm:$0xff]  ;;  %v241_v44 = vld [vmem:[#allocation5 + $0x98] sm:$0xff] }
  0x57   : > { %431 = vmatpush.msrb.mxu0 %v280_v10  ;;  %451 = vmatpush.msrb.mxu1 %v344_v11  ;;  %v305_v45 = vld [vmem:[#allocation5 + $0x298] sm:$0xff]  ;;  %v244_v46 = vld [vmem:[#allocation5 + $0xb0] sm:$0xff]  ;;  %v532_v11 = vperm.slane %v510_v4, 1 }
  0x58   : > { %473 = vmatpush.msrb.mxu2 %v273_v12  ;;  %493 = vmatpush.msrb.mxu3 %v337_v13  ;;  %v308_v47 = vld [vmem:[#allocation5 + $0x2b0] sm:$0xff]  ;;  %v237_v48 = vld [vmem:[#allocation5 + $0x78] sm:$0xff] }
  0x59   : > { %432 = vmatpush.msrb.mxu0 %v276_v14  ;;  %452 = vmatpush.msrb.mxu1 %v340_v15  ;;  %v301_v49 = vld [vmem:[#allocation5 + $0x278] sm:$0xff]  ;;  %v240_v50 = vld [vmem:[#allocation5 + $0x90] sm:$0xff] }
  0x5a   : > { %474 = vmatpush.msrb.mxu2 %v269_v16  ;;  %494 = vmatpush.msrb.mxu3 %v333_v17  ;;  %v304_v51 = vld [vmem:[#allocation5 + $0x290] sm:$0xff]  ;;  %v233_v52 = vld [vmem:[#allocation5 + $0x58] sm:$0xff] }
  0x5b   : > { %433 = vmatpush.msrb.mxu0 %v272_v18  ;;  %453 = vmatpush.msrb.mxu1 %v336_v19  ;;  %v297_v53 = vld [vmem:[#allocation5 + $0x258] sm:$0xff]  ;;  %v236_v54 = vld [vmem:[#allocation5 + $0x70] sm:$0xff] }
  0x5c   : > { %475 = vmatpush.msrb.mxu2 %v265_v20  ;;  %495 = vmatpush.msrb.mxu3 %v329_v21  ;;  %v300_v55 = vld [vmem:[#allocation5 + $0x270] sm:$0xff]  ;;  %v229_v56 = vld [vmem:[#allocation5 + $0x38] sm:$0xff] }
  0x5d   : > { %434 = vmatpush.msrb.mxu0 %v268_v22  ;;  %454 = vmatpush.msrb.mxu1 %v332_v23  ;;  %v293_v57 = vld [vmem:[#allocation5 + $0x238] sm:$0xff]  ;;  %v232_v58 = vld [vmem:[#allocation5 + $0x50] sm:$0xff] }
  0x5e   : > { %476 = vmatpush.msrb.mxu2 %v261_v24  ;;  %496 = vmatpush.msrb.mxu3 %v325_v25  ;;  %v296_v59 = vld [vmem:[#allocation5 + $0x250] sm:$0xff]  ;;  %v225_v60 = vld [vmem:[#allocation5 + $0x18] sm:$0xff] }
  0x5f   : > { %435 = vmatpush.msrb.mxu0 %v264_v26  ;;  %455 = vmatpush.msrb.mxu1 %v328_v27  ;;  %v289_v61 = vld [vmem:[#allocation5 + $0x218] sm:$0xff]  ;;  %v228_v62 = vld [vmem:[#allocation5 + $0x30] sm:$0xff] }
  0x60   : > { %477 = vmatpush.msrb.mxu2 %v257_v28  ;;  %497 = vmatpush.msrb.mxu3 %v321_v29  ;;  %v292_v63 = vld [vmem:[#allocation5 + $0x230] sm:$0xff] }
  0x61   : > { %436 = vmatpush.msrb.mxu0 %v260_v30  ;;  %456 = vmatpush.msrb.mxu1 %v324_v31  ;;  %v224_v2 = vld [vmem:[#allocation5 + $0x10] sm:$0xff]  ;;  %v555_v31 = vperm.slane %v510_v4, 3 }
  0x62   : > { %478 = vmatpush.msrb.mxu2 %v253_v32  ;;  %498 = vmatpush.msrb.mxu3 %v317_v33  ;;  %v288_v3 = vld [vmem:[#allocation5 + $0x210] sm:$0xff]  ;;  %v553_v33 = vperm.slane %v510_v4, 2 }
  0x63   : > { %437 = vmatpush.msrb.mxu0 %v256_v34  ;;  %457 = vmatpush.msrb.mxu1 %v320_v35 }
  0x64   : > { %479 = vmatpush.msrb.mxu2 %v249_v36  ;;  %499 = vmatpush.msrb.mxu3 %v313_v37 }
  0x65   : > { %438 = vmatpush.msrb.mxu0 %v252_v38  ;;  %458 = vmatpush.msrb.mxu1 %v316_v39 }
  0x66   : > { %480 = vmatpush.msrb.mxu2 %v245_v40  ;;  %500 = vmatpush.msrb.mxu3 %v309_v41 }
  0x67   : > { %439 = vmatpush.msrb.mxu0 %v248_v42  ;;  %459 = vmatpush.msrb.mxu1 %v312_v43 }
  0x68   : > { %481 = vmatpush.msrb.mxu2 %v241_v44  ;;  %501 = vmatpush.msrb.mxu3 %v305_v45 }
  0x69   : > { %440 = vmatpush.msrb.mxu0 %v244_v46  ;;  %460 = vmatpush.msrb.mxu1 %v308_v47 }
  0x6a   : > { %482 = vmatpush.msrb.mxu2 %v237_v48  ;;  %502 = vmatpush.msrb.mxu3 %v301_v49 }
  0x6b   : > { %441 = vmatpush.msrb.mxu0 %v240_v50  ;;  %461 = vmatpush.msrb.mxu1 %v304_v51 }
  0x6c   : > { %483 = vmatpush.msrb.mxu2 %v233_v52  ;;  %503 = vmatpush.msrb.mxu3 %v297_v53 }
  0x6d   : > { %442 = vmatpush.msrb.mxu0 %v236_v54  ;;  %462 = vmatpush.msrb.mxu1 %v300_v55 }
  0x6e   : > { %484 = vmatpush.msrb.mxu2 %v229_v56  ;;  %504 = vmatpush.msrb.mxu3 %v293_v57 }
  0x6f   : > { %443 = vmatpush.msrb.mxu0 %v232_v58  ;;  %463 = vmatpush.msrb.mxu1 %v296_v59 }
  0x70   : > { %485 = vmatpush.msrb.mxu2 %v225_v60  ;;  %505 = vmatpush.msrb.mxu3 %v289_v61 }
  0x71   : > { %486 = vmatmul.f32.vlgmr.msrb.gmra.mxu2 %v1069_v0  ;;  %506 = vmatmul.f32.vlgmr.msrb.gmra.mxu3 %v1072_v1 }
  0x72   : > { %444 = vmatpush.msrb.mxu0 %v228_v62  ;;  %464 = vmatpush.msrb.mxu1 %v292_v63 }
  0x74   : > { %445 = vmatpush.msrb.mxu0 %v224_v2  ;;  %465 = vmatpush.msrb.mxu1 %v288_v3 }
  0x75   : > { %446 = vmatmul.f32.vlgmr.msrb.gmra.mxu0 %v1069_v0  ;;  %466 = vmatmul.f32.vlgmr.msrb.gmra.mxu1 %v1072_v1 }
  0xce   : > { %v367_v6 = vpop.f32.mrf.mxu0  ;;  %v387_v7 = vpop.f32.mrf.mxu1 }
  0xcf   : > { %v388_v8 = vadd.f32 %v387_v7, %v367_v6 }
  0xd1   : > { %v512_v9 = vadd.f32 %v511_v5, %v388_v8 }
  0xd3   : > { %v682_v10 = vmul.f32 -1.442695, %v512_v9 }
  0xd5   : > { %758 = vpow2.f32 %v682_v10 }
  0xd6   : > { %v407_v12 = vpop.f32.mrf.mxu2  ;;  %v427_v13 = vpop.f32.mrf.mxu3 }
  0xd7   : > { %v428_v14 = vadd.f32 %v427_v13, %v407_v12 }
  0xd9   : > { %v533_v15 = vadd.f32 %v532_v11, %v428_v14 }
  0xdb   : > { %v759_v16 = vpop.eup %758  ;;  %v683_v17 = vmul.f32 -1.442695, %v533_v15 }
  0xdc   : > { %v516_v18 = vadd.f32 1.0, %v759_v16 }
  0xdd   : > { %760 = vpow2.f32 %v683_v17 }
  0xde   : > { %762 = vrcp.f32 %v516_v18  ;;  %vm522_vm0 = vweird.f32 %v516_v18  ;;  %v528_v27 = vand.u32 2147483648, %v516_v18  ;;  %v526_v30 = vand.u32 2147483647, %v516_v18 }
  0xe0   : > { %v529_v39 = vor.u32 1.1754944e-38, %v528_v27  ;;  %vm527_vm3 = vcmp.eq.f32.partialorder %v526_v30, 8.507059e+37 }
  0xe3   : > { %v761_v0 = vpop.eup %760 }
  0xe4   : > { %v763_v19 = vpop.eup %762  ;;  %v537_v20 = vadd.f32 1.0, %v761_v0 }
  0xe5   : > { %v518_v21 = vmul.f32 %v763_v19, %v516_v18  ;;  %vm523_vm1 = vweird.f32 %v763_v19 }
  0xe6   : > { %764 = vrcp.f32 %v537_v20  ;;  %vm524_vm2 = vmor %vm522_vm0, %vm523_vm1  ;;  %vm543_vm4 = vweird.f32 %v537_v20  ;;  %v549_v46 = vand.u32 2147483648, %v537_v20  ;;  %v547_v48 = vand.u32 2147483647, %v537_v20 }
  0xe7   : > { %v519_v22 = vsub.f32 1.0, %v518_v21 }
  0xe8   : > { %v550_v49 = vor.u32 1.1754944e-38, %v549_v46  ;;  %vm548_vm7 = vcmp.eq.f32.partialorder %v547_v48, 8.507059e+37 }
  0xe9   : > { %v520_v23 = vmul.f32 %v763_v19, %v519_v22 }
  0xeb   : > { %v521_v25 = vadd.f32 %v763_v19, %v520_v23 }
  0xec   : > { %v765_v24 = vpop.eup %764 }
  0xed   : > { %v539_v26 = vmul.f32 %v765_v24, %v537_v20  ;;  %v525_v37 = vsel %vm524_vm2, %v763_v19, %v521_v25  ;;  %vm544_vm5 = vweird.f32 %v765_v24 }
  0xee   : > { %v530_v42 = vsel %vm527_vm3, %v529_v39, %v525_v37  ;;  %vm545_vm6 = vmor %vm543_vm4, %vm544_vm5 }
  0xef   : > { %v540_v38 = vsub.f32 1.0, %v539_v26 }
  0xf1   : > { %v541_v44 = vmul.f32 %v765_v24, %v540_v38 }
  0xf2   : > { %v447_v28 = vpop.f32.mrf.mxu0  ;;  %v467_v29 = vpop.f32.mrf.mxu1 }
  0xf3   : > { %v468_v32 = vadd.f32 %v467_v29, %v447_v28  ;;  %v542_v47 = vadd.f32 %v765_v24, %v541_v44 }
  0xf4   : > { %v487_v34 = vpop.f32.mrf.mxu2  ;;  %v507_v35 = vpop.f32.mrf.mxu3 }
  0xf5   : > { %v508_v36 = vadd.f32 %v507_v35, %v487_v34  ;;  %v554_v41 = vadd.f32 %v553_v33, %v468_v32  ;;  %v546_v50 = vsel %vm545_vm6, %v765_v24, %v542_v47 }
  0xf6   : > { %v551_v53 = vsel %vm548_vm7, %v550_v49, %v546_v50 }
  0xf7   : > { %v556_v40 = vadd.f32 %v555_v31, %v508_v36 }
  0xf9   : > { %v557_v43 = vmul.f32 %v556_v40, %v530_v42 }
  0xfb   : > { %v558_v45 = vadd.f32 %v557_v43, %v554_v41 }
  0xfd   : > { %766 = vtanh.f32 %v558_v45 }
 0x103   : > { %v767_v51 = vpop.eup %766 }
 0x104   : > { %v560_v52 = vsub.f32 %v1072_v1, %v767_v51 }
 0x106   : > { %v561_v54 = vmul.f32 %v560_v52, %v551_v53 }
 0x108   : > { %v562_v55 = vadd.f32 %v767_v51, %v561_v54 }
 0x10a   : > { %563 = vst [vmem:[%s219_s27] sm:$0xff] %v562_v55 }
 0x10b   : > { %885 = shalt.err (!%p882_p9)
}
 0x10c   : > { %699 = dma.vmem_to_hbm [thread:$0]  (%p1023_p4), %s578_s28, 128, %s580_s29, %s565_s19  }
 0x10d PF: > { %s591_s10 = sand.u32 1, %s916_s12   ;;  %p1127_p10 = scmp.ge.s32.totalorder %s928_s15, 2 }
 0x10e   : > { %s592_s22 = scalar_lea.sflag [#allocation4], %s591_s10 }
 0x10f   : > { %p713_p13 = pnand %p1127_p10, %p1027_p6 }
 0x111   : > { %p714_p11 = pneg %p713_p13 }
 0x113   : > { %911 = dma.done.wait (%p714_p11), %s592_s22, 128  }
 0x114   : > { %913 = vsyncadd (%p714_p11), %s592_s22, 4294967168  ;;  %p17_p0 = scmp.ge.s32.totalorder %s997_s4, 4   ;;  %s1128_s12 = smov %s920_s13 }
 0x115   : > { %s1129_s13 = smov %s924_s14  ;;  %s1130_s14 = smov %s1008_s7 }
 0x116   : > { %s1131_s15 = smov %s997_s4  ;;  %19 = sbr.rel (!%p17_p0) target bundleno = 6 (0x6), region = 85 }
 0x11b   :  { %598 = vsyncpa [#allocation3], 1 }
 0x11c   :  { %600 = vsyncpa [#allocation3 + $0x1], 1 }
 0x11d   :  { %601 = vsyncpa [#allocation6], 1 }
 0x11e   :  { %602 = vsyncpa [#allocation4], 1 }
 0x11f   :  { %604 = vsyncpa [#allocation4 + $0x1], 1 }

</bundles_post_ra>
